<compile_context>
chip_gen: v5e
topology: v5e:2x2
jax: 0.10.0
libtpu: 0.0.40
codegen_flags: <defaults>
</compile_context>

<pallas_src>
import functools

import jax
import jax.numpy as jnp
from jax.experimental import pallas as pl
from jax.experimental.pallas import tpu as pltpu


def mlp_kernel(x_ref, w1_ref, b1_ref, w2_ref, b2_ref, w3_ref, b3_ref, o_ref):
    # Cast x to bf16 in-kernel (avoids a wrapper-side pad/cast pass over HBM).
    x = x_ref[...].astype(jnp.bfloat16)
    # Layer 1: bf16 MXU matmul, f32 accumulation, f32 bias + ReLU.
    h1 = jnp.dot(x, w1_ref[...], preferred_element_type=jnp.float32)
    h1 = jnp.maximum(h1 + b1_ref[...], 0.0)
    # Layer 2 (re-cast activation to bf16 for the MXU).
    h2 = jnp.dot(h1.astype(jnp.bfloat16), w2_ref[...],
                 preferred_element_type=jnp.float32)
    h2 = jnp.maximum(h2 + b2_ref[...], 0.0)
    # Layer 3 (no activation). Output block is only out_f lanes wide, so the
    # HBM writeback is ~out_f/128 of a lane-padded slab.
    out = jnp.dot(h2.astype(jnp.bfloat16), w3_ref[...],
                  preferred_element_type=jnp.float32)
    o_ref[...] = (out + b3_ref[...]).astype(o_ref.dtype)


def _round_up(v, m):
    return (v + m - 1) // m * m


def _pad2(a, rows, cols, dtype):
    a = a.astype(dtype)
    return jnp.pad(a, ((0, rows - a.shape[0]), (0, cols - a.shape[1])))


def pack_params(params):
    """One-time packing (call OUTSIDE the per-step path): pad hidden dims to
    128 lanes, cast weights to bf16 (MXU) and biases to f32 (VPU).

    Zero-padding is exact: padded hidden lanes get bias 0 -> ReLU(0)=0, and
    the corresponding padded weight rows are 0, so real lanes are unchanged.
    """
    w1, b1, w2, b2, w3, b3 = params
    in_f, hid = w1.shape
    out_f = w3.shape[1]
    hid_p = _round_up(hid, 128)

    w1_p = _pad2(w1, in_f, hid_p, jnp.bfloat16)   # (in_f, hid_p) — in_f unpadded
    b1_p = _pad2(b1, 1, hid_p, jnp.float32)
    w2_p = _pad2(w2, hid_p, hid_p, jnp.bfloat16)
    b2_p = _pad2(b2, 1, hid_p, jnp.float32)
    w3_p = _pad2(w3, hid_p, out_f, jnp.bfloat16)  # lanes kept at out_f (narrow)
    b3_p = b3.astype(jnp.float32)                 # (1, out_f)
    return (w1_p, b1_p, w2_p, b2_p, w3_p, b3_p)


@functools.partial(jax.jit, static_argnames=("tb_max",))
def mlp_forward(x, packed_params, *, tb_max=512):
    """Fused 3-layer MLP as one Pallas kernel, tiled over the batch."""
    w1, b1, w2, b2, w3, b3 = packed_params
    B, in_f = x.shape
    hid_p = w1.shape[1]
    out_f = w3.shape[1]

    # Balanced batch tiling: >=2 grid steps whenever the batch can be split
    # (so v7x's two TensorCores both get work); tile rounded to 8 sublanes and
    # sized so the last tile is nearly full (no 2x-overshoot cliff).
    min_steps = 2 if B > 8 else 1
    steps = max(pl.cdiv(B, tb_max), min_steps)
    tb = _round_up(pl.cdiv(B, steps), 8)
    b_pad = _round_up(B, tb)
    if b_pad != B:
        x = jnp.pad(x, ((0, b_pad - B), (0, 0)))   # batch-only pad, rare path
    grid = (b_pad // tb,)

    flops = 2 * b_pad * (in_f * hid_p + hid_p * hid_p + hid_p * out_f)
    bytes_accessed = (
        x.dtype.itemsize * x.size                      # x read (f32, unpadded lanes)
        + 2 * (w1.size + w2.size + w3.size)            # bf16 weights (resident)
        + 4 * (b1.size + b2.size + b3.size)            # f32 biases
        + 4 * b_pad * out_f                            # f32 narrow output
    )

    out = pl.pallas_call(
        mlp_kernel,
        out_shape=jax.ShapeDtypeStruct((b_pad, out_f), jnp.float32),
        grid_spec=pltpu.PrefetchScalarGridSpec(
            num_scalar_prefetch=0,
            grid=grid,
            in_specs=[
                pl.BlockSpec((tb, in_f), lambda i: (i, 0)),      # x tile (unpadded)
                pl.BlockSpec((in_f, hid_p), lambda i: (0, 0)),   # w1 (resident)
                pl.BlockSpec((1, hid_p), lambda i: (0, 0)),      # b1
                pl.BlockSpec((hid_p, hid_p), lambda i: (0, 0)),  # w2
                pl.BlockSpec((1, hid_p), lambda i: (0, 0)),      # b2
                pl.BlockSpec((hid_p, out_f), lambda i: (0, 0)),  # w3 (narrow lanes)
                pl.BlockSpec((1, out_f), lambda i: (0, 0)),      # b3
            ],
            out_specs=pl.BlockSpec((tb, out_f), lambda i: (i, 0)),
        ),
        compiler_params=pltpu.CompilerParams(
            dimension_semantics=("parallel",),
        ),
        cost_estimate=pl.CostEstimate(
            flops=flops, transcendentals=0, bytes_accessed=bytes_accessed),
    )(x, w1, b1, w2, b2, w3, b3)

    # Slice off the (rare) batch padding.
    return out[:B] if b_pad != B else out


def init_params(key, input_size, hidden_size=64, output_size=3, dtype=jnp.float32):
    """Deterministic synthetic init (PyTorch-like uniform fan-in scaling)."""
    ks = jax.random.split(key, 6)

    def lin(kw, kb, fan_in, fan_out):
        bound = 1.0 / jnp.sqrt(jnp.asarray(fan_in, jnp.float32))
        w = jax.random.uniform(kw, (fan_in, fan_out), dtype, -bound, bound)
        b = jax.random.uniform(kb, (1, fan_out), dtype, -bound, bound)
        return w, b

    w1, b1 = lin(ks[0], ks[1], input_size, hidden_size)
    w2, b2 = lin(ks[2], ks[3], hidden_size, hidden_size)
    w3, b3 = lin(ks[4], ks[5], hidden_size, output_size)
    return (w1, b1, w2, b2, w3, b3)


def mlp_reference(x, params, compute_dtype=jnp.float32):
    """Pure-JAX reference; compute_dtype=bfloat16 mirrors the kernel's dtype path."""
    w1, b1, w2, b2, w3, b3 = params
    c = lambda a: a.astype(compute_dtype)
    h1 = jnp.maximum(
        jnp.dot(c(x), c(w1), preferred_element_type=jnp.float32) + b1, 0.0)
    h2 = jnp.maximum(
        jnp.dot(c(h1), c(w2), preferred_element_type=jnp.float32) + b2, 0.0)
    return jnp.dot(c(h2), c(w3), preferred_element_type=jnp.float32) + b3


if __name__ == "__main__":
    key = jax.random.PRNGKey(0)
    k_x, k_p = jax.random.split(key)

    batch, input_size, hidden_size, output_size = 16, 32, 64, 3
    x = jax.random.normal(k_x, (batch, input_size), jnp.float32)
    params = init_params(k_p, input_size, hidden_size, output_size)

    # One-time weight packing (outside the per-call path).
    packed = pack_params(params)

    out = mlp_forward(x, packed)
    out = jax.block_until_ready(out)
    assert out.shape == (batch, output_size)

    # Same bf16-MXU / f32-accumulate path as the kernel -> tight tolerance.
    ref_bf16 = mlp_reference(x, params, compute_dtype=jnp.bfloat16)
    assert jnp.allclose(out, ref_bf16, atol=2e-3, rtol=2e-3), "mismatch vs bf16 reference"

    # Full-f32 reference -> looser tolerance (bf16 operand rounding).
    ref_f32 = mlp_reference(x, params, compute_dtype=jnp.float32)
    assert jnp.allclose(out, ref_f32, atol=5e-2, rtol=5e-2), "mismatch vs f32 reference"

    print("KERNEL_OK")
</pallas_src>

<mosaic_0001>
module attributes {stable_mosaic.version = 11 : i64} {
  func.func @mlp_kernel(%arg0: i32, %arg1: memref<8x32xf32, #tpu.memory_space<vmem>>, %arg2: memref<32x128xbf16, #tpu.memory_space<vmem>>, %arg3: memref<1x128xf32, #tpu.memory_space<vmem>>, %arg4: memref<128x128xbf16, #tpu.memory_space<vmem>>, %arg5: memref<1x128xf32, #tpu.memory_space<vmem>>, %arg6: memref<128x3xbf16, #tpu.memory_space<vmem>>, %arg7: memref<1x3xf32, #tpu.memory_space<vmem>>, %arg8: memref<8x3xf32, #tpu.memory_space<vmem>>) attributes {dimension_semantics = [#tpu.dimension_semantics<parallel>], iteration_bounds = array<i64: 2>, scalar_prefetch = 0 : i64, scratch_operands = 0 : i64, tpu.core_type = #tpu.core_type<tc>, window_params = [{transform_indices = @transform_0, window_bounds = array<i64: 8, 32>}, {pipeline_mode = #tpu.pipeline_mode<synchronous>, transform_indices = @transform_1, window_bounds = array<i64: 32, 128>}, {pipeline_mode = #tpu.pipeline_mode<synchronous>, transform_indices = @transform_2, window_bounds = array<i64: 1, 128>}, {pipeline_mode = #tpu.pipeline_mode<synchronous>, transform_indices = @transform_3, window_bounds = array<i64: 128, 128>}, {pipeline_mode = #tpu.pipeline_mode<synchronous>, transform_indices = @transform_4, window_bounds = array<i64: 1, 128>}, {pipeline_mode = #tpu.pipeline_mode<synchronous>, transform_indices = @transform_5, window_bounds = array<i64: 128, 3>}, {pipeline_mode = #tpu.pipeline_mode<synchronous>, transform_indices = @transform_6, window_bounds = array<i64: 1, 3>}, {transform_indices = @transform_7, window_bounds = array<i64: 8, 3>}]} {
    %c0 = arith.constant 0 : index
    %c0_0 = arith.constant 0 : index
    %0 = vector.load %arg1[%c0, %c0_0] : memref<8x32xf32, #tpu.memory_space<vmem>>, vector<8x32xf32>
    %1 = arith.truncf %0 : vector<8x32xf32> to vector<8x32xbf16>
    %c0_1 = arith.constant 0 : index
    %c0_2 = arith.constant 0 : index
    %2 = vector.load %arg2[%c0_1, %c0_2] : memref<32x128xbf16, #tpu.memory_space<vmem>>, vector<32x128xbf16>
    %cst = arith.constant dense<0.000000e+00> : vector<8x128xf32>
    %3 = tpu.matmul %1, %2, %cst {dimension_numbers = #tpu.dot_dimension_numbers<[1], [0], [0], [1], [0, 0, 1, 1], [], []>} : vector<8x32xbf16>, vector<32x128xbf16>, vector<8x128xf32> -> vector<8x128xf32>
    %c0_3 = arith.constant 0 : index
    %c0_4 = arith.constant 0 : index
    %4 = vector.load %arg3[%c0_3, %c0_4] : memref<1x128xf32, #tpu.memory_space<vmem>>, vector<1x128xf32>
    %5 = vector.broadcast %4 : vector<1x128xf32> to vector<8x128xf32>
    %6 = arith.addf %3, %5 : vector<8x128xf32>
    %cst_5 = arith.constant 0.000000e+00 : f32
    %7 = vector.broadcast %cst_5 : f32 to vector<8x128xf32>
    %8 = arith.maximumf %6, %7 : vector<8x128xf32>
    %9 = arith.truncf %8 : vector<8x128xf32> to vector<8x128xbf16>
    %c0_6 = arith.constant 0 : index
    %c0_7 = arith.constant 0 : index
    %10 = vector.load %arg4[%c0_6, %c0_7] : memref<128x128xbf16, #tpu.memory_space<vmem>>, vector<128x128xbf16>
    %cst_8 = arith.constant dense<0.000000e+00> : vector<8x128xf32>
    %11 = tpu.matmul %9, %10, %cst_8 {dimension_numbers = #tpu.dot_dimension_numbers<[1], [0], [0], [1], [0, 0, 1, 1], [], []>} : vector<8x128xbf16>, vector<128x128xbf16>, vector<8x128xf32> -> vector<8x128xf32>
    %c0_9 = arith.constant 0 : index
    %c0_10 = arith.constant 0 : index
    %12 = vector.load %arg5[%c0_9, %c0_10] : memref<1x128xf32, #tpu.memory_space<vmem>>, vector<1x128xf32>
    %13 = vector.broadcast %12 : vector<1x128xf32> to vector<8x128xf32>
    %14 = arith.addf %11, %13 : vector<8x128xf32>
    %cst_11 = arith.constant 0.000000e+00 : f32
    %15 = vector.broadcast %cst_11 : f32 to vector<8x128xf32>
    %16 = arith.maximumf %14, %15 : vector<8x128xf32>
    %17 = arith.truncf %16 : vector<8x128xf32> to vector<8x128xbf16>
    %c0_12 = arith.constant 0 : index
    %c0_13 = arith.constant 0 : index
    %18 = vector.load %arg6[%c0_12, %c0_13] : memref<128x3xbf16, #tpu.memory_space<vmem>>, vector<128x3xbf16>
    %cst_14 = arith.constant dense<0.000000e+00> : vector<8x3xf32>
    %19 = tpu.matmul %17, %18, %cst_14 {dimension_numbers = #tpu.dot_dimension_numbers<[1], [0], [0], [1], [0, 0, 1, 1], [], []>} : vector<8x128xbf16>, vector<128x3xbf16>, vector<8x3xf32> -> vector<8x3xf32>
    %c0_15 = arith.constant 0 : index
    %c0_16 = arith.constant 0 : index
    %20 = vector.load %arg7[%c0_15, %c0_16] : memref<1x3xf32, #tpu.memory_space<vmem>>, vector<1x3xf32>
    %21 = vector.broadcast %20 : vector<1x3xf32> to vector<8x3xf32>
    %22 = arith.addf %19, %21 : vector<8x3xf32>
    %c0_17 = arith.constant 0 : index
    %c0_18 = arith.constant 0 : index
    %23 = vector.load %arg8[%c0_17, %c0_18] : memref<8x3xf32, #tpu.memory_space<vmem>>, vector<8x3xf32>
    tpu.vector_store %arg8[%c0_17, %c0_18], %22 {strides = array<i32>} : memref<8x3xf32, #tpu.memory_space<vmem>>, vector<8x3xf32>,
    return
  }
  func.func @transform_0(%arg0: i32) -> (i32, i32) {
    %c0_i32 = arith.constant 0 : i32
    %c0_i32_0 = arith.constant 0 : i32
    return %arg0, %c0_i32 : i32, i32
  }
  func.func @transform_1(%arg0: i32) -> (i32, i32) {
    %c0_i32 = arith.constant 0 : i32
    %c0_i32_0 = arith.constant 0 : i32
    %c0_i32_1 = arith.constant 0 : i32
    return %c0_i32, %c0_i32_0 : i32, i32
  }
  func.func @transform_2(%arg0: i32) -> (i32, i32) {
    %c0_i32 = arith.constant 0 : i32
    %c0_i32_0 = arith.constant 0 : i32
    %c0_i32_1 = arith.constant 0 : i32
    return %c0_i32, %c0_i32_0 : i32, i32
  }
  func.func @transform_3(%arg0: i32) -> (i32, i32) {
    %c0_i32 = arith.constant 0 : i32
    %c0_i32_0 = arith.constant 0 : i32
    %c0_i32_1 = arith.constant 0 : i32
    return %c0_i32, %c0_i32_0 : i32, i32
  }
  func.func @transform_4(%arg0: i32) -> (i32, i32) {
    %c0_i32 = arith.constant 0 : i32
    %c0_i32_0 = arith.constant 0 : i32
    %c0_i32_1 = arith.constant 0 : i32
    return %c0_i32, %c0_i32_0 : i32, i32
  }
  func.func @transform_5(%arg0: i32) -> (i32, i32) {
    %c0_i32 = arith.constant 0 : i32
    %c0_i32_0 = arith.constant 0 : i32
    %c0_i32_1 = arith.constant 0 : i32
    return %c0_i32, %c0_i32_0 : i32, i32
  }
  func.func @transform_6(%arg0: i32) -> (i32, i32) {
    %c0_i32 = arith.constant 0 : i32
    %c0_i32_0 = arith.constant 0 : i32
    %c0_i32_1 = arith.constant 0 : i32
    return %c0_i32, %c0_i32_0 : i32, i32
  }
  func.func @transform_7(%arg0: i32) -> (i32, i32) {
    %c0_i32 = arith.constant 0 : i32
    %c0_i32_0 = arith.constant 0 : i32
    return %arg0, %c0_i32 : i32, i32
  }
}

</mosaic_0001>

<bundles_post_ra>
// kernel: mlp_forward.1
= control target key start
LH: loop header
LB: loop body
LE: loop exit
PB: predicated region body
PF: predicated region fallthrough
CT: control target
= control target key end

     0   :  { %12 = vsyncpa [#allocation3], 0  ;;  %s1057_s0 = inlined_call_operand.hbm [shape: f32[16,32], index: 0, kind: input, shape index: {}]   ;;  %s1058_s1 = inlined_call_operand.hbm [shape: bf16[32,128], index: 1, kind: input, shape index: {}]   ;;  %s1059_s2 = inlined_call_operand.vmem [shape: f32[1,128], index: 2, kind: input, shape index: {}]   ;;  %s1060_s3 = inlined_call_operand.vmem [shape: bf16[128,128], index: 3, kind: input, shape index: {}]   ;;  %s1061_s4 = inlined_call_operand.vmem [shape: f32[1,128], index: 4, kind: input, shape index: {}]   ;;  %s1062_s5 = inlined_call_operand.vmem [shape: bf16[128,3], index: 5, kind: input, shape index: {}]   ;;  %s1063_s6 = inlined_call_operand.vmem [shape: f32[1,3], index: 6, kind: input, shape index: {}]   ;;  %s1064_s7 = inlined_call_operand.vmem [shape: f32[16,3], index: 7, kind: output, shape index: {}]  }
   0x1   :  { %14 = vsyncpa [#allocation3 + $0x1], 0 }
   0x2   :  { %15 = vsyncpa [#allocation5], 0  ;;  %s897_s24 = smov 0   ;;  %s899_s25 = smov 0  }
   0x3   :  { %s901_s26 = smov 0   ;;  %s903_s27 = smov 0  }
   0x4 LB: > { %s215_s30 = sshll.u32 %s1058_s1, 4  ;;  %s919_s8 = sadd.s32 4294967295, %s852_s27   ;;  %s852_s27 = sphi %s903_s27, %s1071_s27   ;;  %s848_s26 = sphi %s901_s26, %s1070_s26   ;;  %s844_s25 = sphi %s899_s25, %s1069_s25   ;;  %s840_s24 = sphi %s897_s24, %s1068_s24   ;;  %s216_s30 = int_to_ptr.hbm [resolvable:$true] %s215_s30 }
   0x5   : > { %p597_p0 = scmp.ge.s32.totalorder %s852_s27, 1  ;;  %p42_p1 = scmp.eq.s32.totalorder %s919_s8, 0 }
   0x6   : > { %p204_p2 = scmp.lt.s32.totalorder %s852_s27, 3  ;;  %s854_s10 = smov [#allocation4]  }
   0x7   : > { %s217_s11 = sshll.u32 %s854_s10, 4  ;;  %s855_s12 = smov 64   ;;  %s218_s11 = int_to_ptr.vmem [resolvable:$true] %s217_s11 }
   0x8   : > { %p924_p3 = pnand %p597_p0, %p204_p2  ;;  %s856_s13 = smov 4  }
   0x9   : > { %s933_s14 = sadd.s32 1, %s852_s27   ;;  %s28_s16 = sadd.s32 1, %s848_s26 }
   0xa   : > { %p705_p4 = pneg %p924_p3  ;;  %s25_s15 = ssub.s32 %s852_s27, %s933_s14 }
   0xb   : > { %p26_p6 = scmp.eq.s32.totalorder %s25_s15, 0  ;;  %p35_p7 = scmp.ne.s32.totalorder %s848_s26, %s844_s25 }
   0xc   : > { %p706_p5 = pnand %p705_p4, %p42_p1  ;;  %p36_p8 = scmp.eq.s32.totalorder %s852_s27, 0 }
   0xd   : > { %p41_p9 = scmp.ne.s32.totalorder %s844_s25, %s840_s24  ;;  %p714_p12 = scmp.lt.s32.totalorder %s852_s27, 2 }
   0xe   : > { %708 = dma.hbm_to_vmem [thread:$0]  (!%p706_p5), %s216_s30, 256, %s218_s11, [#allocation5], %s855_s12, %s855_s12, %s856_s13  }
   0xf   : > { %s943_s17 = scalar_select %p26_p6, %s848_s26, %s28_s16  }
  0x10   : > { %p37_p10 = por %p36_p8, %p35_p7  ;;  %p947_p11 = por %p42_p1, %p41_p9 }
  0x11   : > { %s246_s19 = sand.u32 1, %s848_s26   ;;  %s601_s21 = sshll.u32 %s852_s27, 3 }
  0x12   : > { %s600_s20 = sshll.u32 %s246_s19, 3  ;;  %s254_s28 = scalar_lea.hbm %s1057_s0, %s601_s21 }
  0x13   : > { %s250_s29 = scalar_lea.vmem [#allocation2], %s600_s20  ;;  %s256_s10 = sshll.u32 %s254_s28, 4  ;;  %s257_s10 = int_to_ptr.hbm [resolvable:$true] %s256_s10 }
  0x14   : > { %s258_s30 = sshll.u32 %s250_s29, 4  ;;  %p957_p13 = pnand %p714_p12, %p37_p10  ;;  %s259_s30 = int_to_ptr.vmem [resolvable:$true] %s258_s30 }
  0x15   : > { %s247_s11 = scalar_lea.sflag [#allocation3], %s246_s19  ;;  %s784_s12 = sshra.s32 %s257_s10, 4  ;;  %s785_s12 = int_to_ptr.hbm [resolvable:$true] %s784_s12 }
  0x16   : > { %s786_s13 = scalar_lea.hbm %s785_s12, 8  ;;  %p788_p2 = pneg %p957_p13 }
  0x17   : > { %p787_p0 = scmp.ne.s32.totalorder %s785_s12, %s786_s13  ;;  %s791_s16 = scalar_lea.hbm %s1057_s0, 16 }
  0x18   : > { %p792_p6 = scmp.lt.s32.totalorder %s785_s12, %s1057_s0  ;;  %p793_p7 = scmp.lt.s32.totalorder %s791_s16, %s786_s13 }
  0x19   : > { %p789_p4 = pnand %p788_p2, %p787_p0 }
  0x1a   : > { %p794_p8 = por %p793_p7, %p792_p6 }
  0x1b   : > { %p790_p5 = pneg %p789_p4 }
  0x1d   : > { %p795_p9 = pnand %p794_p8, %p790_p5 }
  0x1f   : > { %798 = shalt.err (!%p795_p9)
}
  0x20   : > { %712 = dma.hbm_to_vmem [thread:$0]  (!%p957_p13), %s257_s10, 128, %s259_s30, %s247_s11  }
  0x21   : > { %267 = sbr.rel (%p924_p3) target bundleno = 453 (0x1c5), region = 48  ;;  %s269_s19 = sand.u32 (!%p924_p3), 1, %s844_s25  }
  0x22   : > { %s603_s22 = sshll.u32 (!%p924_p3), %s269_s19, 3  ;;  %s270_s23 = scalar_lea.sflag (!%p924_p3), [#allocation3], %s269_s19 }
  0x23   : > { %s273_s28 = scalar_lea.vmem (!%p924_p3), [#allocation2], %s603_s22 }
  0x26   : > { %831 = dma.done.wait (%p947_p11), %s270_s23, 128  }
  0x27   : > { %833 = vsyncadd (%p947_p11), %s270_s23, 4294967168 }
  0x28   : > { %835 = dma.done.wait (%p42_p1), [#allocation5], 256  }
  0x29   : > { %837 = vsyncadd (%p42_p1), [#allocation5], 4294967040  ;;  %v682_v0 = vld [vmem:[#allocation4 + $0x8] sm:$0xff]  ;;  %v681_v2 = vld [vmem:[#allocation4] sm:$0xff]  ;;  %vm336_vm0 = vcmask 261120   ;;  %p309_p1 = scmp.lt.s32.totalorder %s919_s8, 1 }
  0x2a   : > { %v690_v1 = vld [vmem:[%s1060_s3 + $0x38] sm:$0xff]  ;;  %346 = vmatpush.bf16.msra.mxu0 %v682_v0  ;;  %v314_v3 = vld [vmem:[%s273_s28] sm:$0xff]  ;;  %v689_v4 = vld [vmem:[%s1060_s3 + $0x30] sm:$0xff]  ;;  %vm519_vm1 = vcmask 23552  }
  0x2b   : > { %423 = vmatpush.bf16.msra.mxu1 %v690_v1  ;;  %v315_v5 = vpack.c.bf16 %v314_v3, %v314_v3  ;;  %v688_v6 = vld [vmem:[%s1060_s3 + $0x28] sm:$0xff]  ;;  %v687_v7 = vld [vmem:[%s1060_s3 + $0x20] sm:$0xff]  ;;  %v686_v8 = vld [vmem:[%s1060_s3 + $0x18] sm:$0xff]  ;;  %s1073_s8 = smov (!%p309_p1, %s919_s8), 1 }
  0x2c   : > { %v685_v9 = vld [vmem:[%s1060_s3 + $0x10] sm:$0xff]  ;;  %v684_v10 = vld [vmem:[%s1060_s3 + $0x8] sm:$0xff]  ;;  %v683_v11 = vld [vmem:[%s1060_s3] sm:$0xff]  ;;  %s605_s9 = sshll.u32 %s1073_s8, 3 }
  0x2d   : > { %v698_v12 = vld [vmem:[%s1062_s5 + $0x38] sm:$0xff]  ;;  %v697_v13 = vld [vmem:[%s1062_s5 + $0x30] sm:$0xff]  ;;  %v696_v14 = vld [vmem:[%s1062_s5 + $0x28] sm:$0xff]  ;;  %s312_s24 = scalar_lea.vmem %s1064_s7, %s605_s9 }
  0x2e   : > { %347 = vmatpush.bf16.msra.mxu0 %v681_v2  ;;  %506 = vmatpush.bf16.msra.mxu2 %v698_v12  ;;  %v695_v15 = vld [vmem:[%s1062_s5 + $0x20] sm:$0xff]  ;;  %v694_v16 = vld [vmem:[%s1062_s5 + $0x18] sm:$0xff]  ;;  %v693_v17 = vld [vmem:[%s1062_s5 + $0x10] sm:$0xff] }
  0x2f   : > { %424 = vmatpush.bf16.msra.mxu1 %v689_v4  ;;  %v751_v18 = vld [vmem:[%s1059_s2] ss:$0 sm:$0xff]  ;;  %v692_v24 = vld [vmem:[%s1062_s5 + $0x8] sm:$0xff] }
  0x30   : > { %v691_v25 = vld [vmem:[%s1062_s5] sm:$0xff] }
  0x31   : > { %614 = vmatmul.msk.bf16.vlgmr.msra.gmra.mxu0 %vm336_vm0, %v315_v5  ;;  %v752_v26 = vld [vmem:[%s1061_s4] ss:$0 sm:$0xff] }
  0x32   : > { %507 = vmatpush.bf16.msra.mxu2 %v697_v13  ;;  %v753_v32 = vld [vmem:[%s1063_s6] ss:$0 sm:$0xff] }
  0x33   : > { %425 = vmatpush.bf16.msra.mxu1 %v688_v6 }
  0x36   : > { %508 = vmatpush.bf16.msra.mxu2 %v696_v14 }
  0x37   : > { %426 = vmatpush.bf16.msra.mxu1 %v687_v7 }
  0x3a   : > { %509 = vmatpush.bf16.msra.mxu2 %v695_v15 }
  0x3b   : > { %427 = vmatpush.bf16.msra.mxu1 %v686_v8 }
  0x3e   : > { %510 = vmatpush.bf16.msra.mxu2 %v694_v16 }
  0x3f   : > { %428 = vmatpush.bf16.msra.mxu1 %v685_v9 }
  0x42   : > { %511 = vmatpush.bf16.msra.mxu2 %v693_v17 }
  0x43   : > { %429 = vmatpush.bf16.msra.mxu1 %v684_v10 }
  0x46   : > { %512 = vmatpush.bf16.msra.mxu2 %v692_v24 }
  0x47   : > { %430 = vmatpush.bf16.msra.mxu1 %v683_v11 }
  0x4a   : > { %513 = vmatpush.bf16.msra.mxu2 %v691_v25 }
  0xae   : > { %v349_v19 = vpop.f32.mrf.mxu0 }
  0xaf   : > { %v350_v20 = vadd.f32 %v751_v18, %v349_v19 }
  0xb1   : > { %v353_v21 = vmax.f32 %v350_v20, 0.0 }
  0xb3   : > { %v354_v22 = vpack.c.bf16 %v353_v21, %v353_v21 }
  0xb5   : > { %431 = vmatmul.bf16.vlgmr.msra.gmra.mxu1 %v354_v22 }
  0xb6   : > { %v351_v23 = vpop.f32.mrf.mxu0 }
 0x132   : > { %v432_v27 = vpop.f32.mrf.mxu1 }
 0x133   : > { %v433_v28 = vadd.f32 %v752_v26, %v432_v27 }
 0x135   : > { %v436_v29 = vmax.f32 %v433_v28, 0.0 }
 0x137   : > { %v437_v30 = vpack.c.bf16 %v436_v29, %v436_v29 }
 0x139   : > { %514 = vmatmul.bf16.vlgmr.msra.gmra.mxu2 %v437_v30 }
 0x13a   : > { %v434_v31 = vpop.f32.mrf.mxu1 }
 0x1bc   : > { %v515_v33 = vpop.f32.mrf.mxu2 }
 0x1bd   : > { %v516_v34 = vadd.f32 %v753_v32, %v515_v33 }
 0x1bf   : > { %520 = vst.msk [vmem:[%s312_s24] sm:$0xff] %vm519_vm1, %v516_v34 }
 0x1c4   : > { %v517_v35 = vpop.f32.mrf.mxu2 }
 0x1c5 PF: > { %p18_p3 = scmp.ge.s32.totalorder %s933_s14, 4   ;;  %s1068_s24 = smov %s844_s25 }
 0x1c6   : > { %s1069_s25 = smov %s848_s26  ;;  %s1070_s26 = smov %s943_s17 }
 0x1c7   : > { %s1071_s27 = smov %s933_s14  ;;  %20 = sbr.rel (!%p18_p3) target bundleno = 4 (0x4), region = 92 }
 0x1cc   :  { %540 = vsyncpa [#allocation3], 1 }
 0x1cd   :  { %542 = vsyncpa [#allocation3 + $0x1], 1 }
 0x1ce   :  { %543 = vsyncpa [#allocation5], 1 }

</bundles_post_ra>
